<compile_context>
chip_gen: v5e
topology: v5e:2x2
jax: 0.10.0
libtpu: 0.0.40
codegen_flags: <defaults>
</compile_context>

<pallas_src>
import functools

import jax
import jax.numpy as jnp
from jax.experimental import pallas as pl
from jax.experimental.pallas import tpu as pltpu
from jax.scipy.linalg import block_diag


_LANES = 128
_SAMPLES_PER_ROW = 16          # 16 samples x 8 features = 128 lanes
_MAX_TILE_ROWS = 8192          # 8192 x 128 x 4 B = 4 MiB per x buffer
_MIN_SPLIT_ROWS = 64           # below this, a single tile (overhead dominates)


def _round_up(n, m):
    return ((n + m - 1) // m) * m


def _sigmoid(z):
    # Exactly sigmoid(z); tanh stays on the EUP slot (no VPU divide).
    return 0.5 * jnp.tanh(0.5 * z) + 0.5


def _choose_tile_rows(rows, block_rows):
    """Packed-row tile size: big enough to amortize step overhead, capped so
    VMEM stays modest and there are >= 2 tiles for megacore (v7x)."""
    target = min(max(block_rows // _SAMPLES_PER_ROW, 8), _MAX_TILE_ROWS)
    target = max(8, (target // 8) * 8)
    if rows <= _MIN_SPLIT_ROWS and rows <= target:
        return rows                                   # one small (full) tile
    n_tiles = max(2, pl.cdiv(rows, target))           # >= 2 so both v7x TCs work
    tile = _round_up(pl.cdiv(rows, n_tiles), 8)       # balanced, multiple of 8
    return min(tile, rows)


def _vmem_limit_bytes(tile_rows):
    """Derived from actual block sizes: double-buffered x + out blocks,
    constant weight/bias blocks, plus margin for compiler scratch."""
    x_blk = tile_rows * _LANES * 4
    out_blk = tile_rows * _LANES * 4          # (tile, 16) lane-pads to 128 in VMEM
    consts = (128 * 128 + 96 * 128 + 64 * 128 + 8 * 128) * 4
    limit = 2 * (x_blk + out_blk) + 2 * consts + (4 << 20)
    return int(max(limit, 8 << 20))


def _mlp_kernel(x_ref, w1_ref, w2_ref, w3_ref, b_ref, o_ref):
    # x_ref: (R, 128) -- 16 samples x 8 features per 128-lane row (dense DMA).
    # w*_ref: 16-way block-diagonal weights; b_ref: (8, 128) packed biases.
    x = x_ref[...]
    bp = b_ref[...]

    # Layer 1: (R, 128) @ (128, 96) -> (R, 96); K=128, no transposed operand.
    z1 = jnp.dot(x, w1_ref[...], preferred_element_type=jnp.float32)
    h1 = _sigmoid(z1 + bp[0:1, :96])

    # Layer 2: (R, 96) @ (96, 64) -> (R, 64)
    z2 = jnp.dot(h1, w2_ref[...], preferred_element_type=jnp.float32)
    h2 = _sigmoid(z2 + bp[1:2, :64])

    # Layer 3: (R, 64) @ (64, 16) -> (R, 16)  == 16 scalar outputs per row
    z3 = jnp.dot(h2, w3_ref[...], preferred_element_type=jnp.float32)
    o_ref[...] = _sigmoid(z3 + bp[2:3, :16]).astype(o_ref.dtype)


@functools.partial(jax.jit, static_argnames=("block_rows",))
def wide_deep_forward(x, packed, *, block_rows=131072):
    """x: (B, 8) float32. packed: kernel-ready params from pack_params()."""
    B, F = x.shape
    assert F == 8

    # Only copy when B is not a multiple of 16 (pad to next multiple of 16,
    # never to a tile multiple). Common data-loader batches take the
    # zero-copy path: reshape (B, 8) -> (B/16, 128) is a free relabel.
    B16 = _round_up(max(B, 1), _SAMPLES_PER_ROW)
    if B16 != B:
        x = jnp.pad(x, ((0, B16 - B), (0, 0)))
    rows = B16 // _SAMPLES_PER_ROW
    x_packed = x.reshape(rows, _LANES)

    tile_rows = _choose_tile_rows(rows, block_rows)
    n_steps = pl.cdiv(rows, tile_rows)   # ragged final block masked by Pallas

    out = pl.pallas_call(
        _mlp_kernel,
        out_shape=jax.ShapeDtypeStruct((rows, 16), jnp.float32),
        grid=(n_steps,),
        in_specs=[
            pl.BlockSpec((tile_rows, _LANES), lambda i: (i, 0)),  # streamed x tiles
            pl.BlockSpec((128, 96), lambda i: (0, 0)),            # W1 block-diag
            pl.BlockSpec((96, 64), lambda i: (0, 0)),             # W2 block-diag
            pl.BlockSpec((64, 16), lambda i: (0, 0)),             # W3 block-diag
            pl.BlockSpec((8, 128), lambda i: (0, 0)),             # packed biases
        ],
        out_specs=pl.BlockSpec((tile_rows, 16), lambda i: (i, 0)),
        compiler_params=pltpu.CompilerParams(
            dimension_semantics=("parallel",),                    # megacore sharding
            vmem_limit_bytes=_vmem_limit_bytes(tile_rows),
        ),
    )(x_packed, packed["w1bd"], packed["w2bd"], packed["w3bd"], packed["bpack"])

    # (rows, 16) -> (B16, 1) is a free row-major relabel; drop any 16-pad rows.
    y = out.reshape(B16, 1)
    return y if B16 == B else y[:B]


def init_params(key):
    """nn.Linear-style init, PyTorch (out, in) orientation."""
    ks = jax.random.split(key, 6)

    def uinit(k, shape, fan_in):
        bound = 1.0 / jnp.sqrt(fan_in)
        return jax.random.uniform(k, shape, jnp.float32, -bound, bound)

    return {
        "w1": uinit(ks[0], (6, 8), 8.0), "b1": uinit(ks[1], (6,), 8.0),
        "w2": uinit(ks[2], (4, 6), 6.0), "b2": uinit(ks[3], (4,), 6.0),
        "w3": uinit(ks[4], (1, 4), 4.0), "b3": uinit(ks[5], (1,), 4.0),
    }


def pack_params(params):
    """Precompute (once, off the hot path) the 16-way block-diagonal weights
    and the single packed bias block used by the kernel."""
    n = _SAMPLES_PER_ROW
    w1bd = block_diag(*([params["w1"].T] * n)).astype(jnp.float32)   # (128, 96)
    w2bd = block_diag(*([params["w2"].T] * n)).astype(jnp.float32)   # (96, 64)
    w3bd = block_diag(*([params["w3"].T] * n)).astype(jnp.float32)   # (64, 16)
    bpack = jnp.zeros((8, 128), jnp.float32)
    bpack = bpack.at[0, :96].set(jnp.tile(params["b1"], n))
    bpack = bpack.at[1, :64].set(jnp.tile(params["b2"], n))
    bpack = bpack.at[2, :16].set(jnp.tile(params["b3"], n))
    return {"w1bd": w1bd, "w2bd": w2bd, "w3bd": w3bd, "bpack": bpack}


def reference_forward(x, params):
    h1 = jax.nn.sigmoid(x @ params["w1"].T + params["b1"])
    h2 = jax.nn.sigmoid(h1 @ params["w2"].T + params["b2"])
    return jax.nn.sigmoid(h2 @ params["w3"].T + params["b3"])


if __name__ == "__main__":
    key = jax.random.PRNGKey(0)
    pkey, xkey1, xkey2 = jax.random.split(key, 3)

    params = init_params(pkey)
    packed = pack_params(params)

    # Case 1: B % 16 == 0 -> zero-copy packed path; 125 packed rows split into
    # 2 tiles (exercises the pipeline, the megacore split, and the masked
    # ragged final block).
    B1 = 2000
    x1 = jax.random.normal(xkey1, (B1, 8), jnp.float32)
    y1 = wide_deep_forward(x1, packed)
    jax.block_until_ready(y1)
    y1_ref = reference_forward(x1, params)
    assert y1.shape == (B1, 1)
    assert jnp.allclose(y1, y1_ref, atol=1e-5, rtol=1e-5), "mismatch (B=2000)"

    # Case 2: ragged batch (B % 16 != 0) -> tiny pad-to-16 path, single tile.
    B2 = 300
    x2 = jax.random.normal(xkey2, (B2, 8), jnp.float32)
    y2 = wide_deep_forward(x2, packed)
    jax.block_until_ready(y2)
    y2_ref = reference_forward(x2, params)
    assert y2.shape == (B2, 1)
    assert jnp.allclose(y2, y2_ref, atol=1e-5, rtol=1e-5), "mismatch (B=300)"

    print("KERNEL_OK")
</pallas_src>

<mosaic_0001>
module attributes {stable_mosaic.version = 11 : i64} {
  func.func @_mlp_kernel(%arg0: i32, %arg1: memref<64x128xf32, #tpu.memory_space<vmem>>, %arg2: memref<128x96xf32, #tpu.memory_space<vmem>>, %arg3: memref<96x64xf32, #tpu.memory_space<vmem>>, %arg4: memref<64x16xf32, #tpu.memory_space<vmem>>, %arg5: memref<8x128xf32, #tpu.memory_space<vmem>>, %arg6: memref<64x16xf32, #tpu.memory_space<vmem>>) attributes {dimension_semantics = [#tpu.dimension_semantics<parallel>], iteration_bounds = array<i64: 2>, scalar_prefetch = 0 : i64, scratch_operands = 0 : i64, tpu.core_type = #tpu.core_type<tc>, window_params = [{transform_indices = @transform_0, window_bounds = array<i64: 64, 128>}, {pipeline_mode = #tpu.pipeline_mode<synchronous>, transform_indices = @transform_1, window_bounds = array<i64: 128, 96>}, {pipeline_mode = #tpu.pipeline_mode<synchronous>, transform_indices = @transform_2, window_bounds = array<i64: 96, 64>}, {pipeline_mode = #tpu.pipeline_mode<synchronous>, transform_indices = @transform_3, window_bounds = array<i64: 64, 16>}, {pipeline_mode = #tpu.pipeline_mode<synchronous>, transform_indices = @transform_4, window_bounds = array<i64: 8, 128>}, {transform_indices = @transform_5, window_bounds = array<i64: 64, 16>}]} {
    %c0 = arith.constant 0 : index
    %c0_0 = arith.constant 0 : index
    %0 = vector.load %arg1[%c0, %c0_0] : memref<64x128xf32, #tpu.memory_space<vmem>>, vector<64x128xf32>
    %c0_1 = arith.constant 0 : index
    %c0_2 = arith.constant 0 : index
    %1 = vector.load %arg5[%c0_1, %c0_2] : memref<8x128xf32, #tpu.memory_space<vmem>>, vector<8x128xf32>
    %c0_3 = arith.constant 0 : index
    %c0_4 = arith.constant 0 : index
    %2 = vector.load %arg2[%c0_3, %c0_4] : memref<128x96xf32, #tpu.memory_space<vmem>>, vector<128x96xf32>
    %cst = arith.constant dense<0.000000e+00> : vector<64x96xf32>
    %3 = tpu.matmul %0, %2, %cst {dimension_numbers = #tpu.dot_dimension_numbers<[1], [0], [0], [1], [0, 0, 1, 1], [], []>} : vector<64x128xf32>, vector<128x96xf32>, vector<64x96xf32> -> vector<64x96xf32>
    %4 = vector.extract_strided_slice %1 {offsets = [0, 0], sizes = [1, 96], strides = [1, 1]} : vector<8x128xf32> to vector<1x96xf32>
    %5 = vector.broadcast %4 : vector<1x96xf32> to vector<64x96xf32>
    %6 = arith.addf %3, %5 : vector<64x96xf32>
    %cst_5 = arith.constant 5.000000e-01 : f32
    %7 = vector.broadcast %cst_5 : f32 to vector<64x96xf32>
    %8 = arith.mulf %7, %6 : vector<64x96xf32>
    %9 = math.tanh %8 : vector<64x96xf32>
    %cst_6 = arith.constant 5.000000e-01 : f32
    %10 = vector.broadcast %cst_6 : f32 to vector<64x96xf32>
    %11 = arith.mulf %10, %9 : vector<64x96xf32>
    %cst_7 = arith.constant 5.000000e-01 : f32
    %12 = vector.broadcast %cst_7 : f32 to vector<64x96xf32>
    %13 = arith.addf %11, %12 : vector<64x96xf32>
    %c0_8 = arith.constant 0 : index
    %c0_9 = arith.constant 0 : index
    %14 = vector.load %arg3[%c0_8, %c0_9] : memref<96x64xf32, #tpu.memory_space<vmem>>, vector<96x64xf32>
    %cst_10 = arith.constant dense<0.000000e+00> : vector<64x64xf32>
    %15 = tpu.matmul %13, %14, %cst_10 {dimension_numbers = #tpu.dot_dimension_numbers<[1], [0], [0], [1], [0, 0, 1, 1], [], []>} : vector<64x96xf32>, vector<96x64xf32>, vector<64x64xf32> -> vector<64x64xf32>
    %16 = vector.extract_strided_slice %1 {offsets = [1, 0], sizes = [1, 64], strides = [1, 1]} : vector<8x128xf32> to vector<1x64xf32>
    %17 = vector.broadcast %16 : vector<1x64xf32> to vector<64x64xf32>
    %18 = arith.addf %15, %17 : vector<64x64xf32>
    %cst_11 = arith.constant 5.000000e-01 : f32
    %19 = vector.broadcast %cst_11 : f32 to vector<64x64xf32>
    %20 = arith.mulf %19, %18 : vector<64x64xf32>
    %21 = math.tanh %20 : vector<64x64xf32>
    %cst_12 = arith.constant 5.000000e-01 : f32
    %22 = vector.broadcast %cst_12 : f32 to vector<64x64xf32>
    %23 = arith.mulf %22, %21 : vector<64x64xf32>
    %cst_13 = arith.constant 5.000000e-01 : f32
    %24 = vector.broadcast %cst_13 : f32 to vector<64x64xf32>
    %25 = arith.addf %23, %24 : vector<64x64xf32>
    %c0_14 = arith.constant 0 : index
    %c0_15 = arith.constant 0 : index
    %26 = vector.load %arg4[%c0_14, %c0_15] : memref<64x16xf32, #tpu.memory_space<vmem>>, vector<64x16xf32>
    %cst_16 = arith.constant dense<0.000000e+00> : vector<64x16xf32>
    %27 = tpu.matmul %25, %26, %cst_16 {dimension_numbers = #tpu.dot_dimension_numbers<[1], [0], [0], [1], [0, 0, 1, 1], [], []>} : vector<64x64xf32>, vector<64x16xf32>, vector<64x16xf32> -> vector<64x16xf32>
    %28 = vector.extract_strided_slice %1 {offsets = [2, 0], sizes = [1, 16], strides = [1, 1]} : vector<8x128xf32> to vector<1x16xf32>
    %29 = vector.broadcast %28 : vector<1x16xf32> to vector<64x16xf32>
    %30 = arith.addf %27, %29 : vector<64x16xf32>
    %cst_17 = arith.constant 5.000000e-01 : f32
    %31 = vector.broadcast %cst_17 : f32 to vector<64x16xf32>
    %32 = arith.mulf %31, %30 : vector<64x16xf32>
    %33 = math.tanh %32 : vector<64x16xf32>
    %cst_18 = arith.constant 5.000000e-01 : f32
    %34 = vector.broadcast %cst_18 : f32 to vector<64x16xf32>
    %35 = arith.mulf %34, %33 : vector<64x16xf32>
    %cst_19 = arith.constant 5.000000e-01 : f32
    %36 = vector.broadcast %cst_19 : f32 to vector<64x16xf32>
    %37 = arith.addf %35, %36 : vector<64x16xf32>
    %c0_20 = arith.constant 0 : index
    %c0_21 = arith.constant 0 : index
    %38 = vector.load %arg6[%c0_20, %c0_21] : memref<64x16xf32, #tpu.memory_space<vmem>>, vector<64x16xf32>
    tpu.vector_store %arg6[%c0_20, %c0_21], %37 {strides = array<i32>} : memref<64x16xf32, #tpu.memory_space<vmem>>, vector<64x16xf32>,
    return
  }
  func.func @transform_0(%arg0: i32) -> (i32, i32) {
    %c0_i32 = arith.constant 0 : i32
    %c0_i32_0 = arith.constant 0 : i32
    return %arg0, %c0_i32 : i32, i32
  }
  func.func @transform_1(%arg0: i32) -> (i32, i32) {
    %c0_i32 = arith.constant 0 : i32
    %c0_i32_0 = arith.constant 0 : i32
    %c0_i32_1 = arith.constant 0 : i32
    return %c0_i32, %c0_i32_0 : i32, i32
  }
  func.func @transform_2(%arg0: i32) -> (i32, i32) {
    %c0_i32 = arith.constant 0 : i32
    %c0_i32_0 = arith.constant 0 : i32
    %c0_i32_1 = arith.constant 0 : i32
    return %c0_i32, %c0_i32_0 : i32, i32
  }
  func.func @transform_3(%arg0: i32) -> (i32, i32) {
    %c0_i32 = arith.constant 0 : i32
    %c0_i32_0 = arith.constant 0 : i32
    %c0_i32_1 = arith.constant 0 : i32
    return %c0_i32, %c0_i32_0 : i32, i32
  }
  func.func @transform_4(%arg0: i32) -> (i32, i32) {
    %c0_i32 = arith.constant 0 : i32
    %c0_i32_0 = arith.constant 0 : i32
    %c0_i32_1 = arith.constant 0 : i32
    return %c0_i32, %c0_i32_0 : i32, i32
  }
  func.func @transform_5(%arg0: i32) -> (i32, i32) {
    %c0_i32 = arith.constant 0 : i32
    %c0_i32_0 = arith.constant 0 : i32
    return %arg0, %c0_i32 : i32, i32
  }
}

</mosaic_0001>

<bundles_post_ra>
// kernel: wide_deep_forward.1
= control target key start
LH: loop header
LB: loop body
LE: loop exit
PB: predicated region body
PF: predicated region fallthrough
CT: control target
= control target key end

     0   :  { %s759_s18 = smov 0   ;;  %s943_s0 = inlined_call_operand.vmem [shape: f32[125,128], index: 0, kind: input, shape index: {}]   ;;  %s944_s1 = inlined_call_operand.vmem [shape: f32[128,96], index: 1, kind: input, shape index: {}]   ;;  %s945_s2 = inlined_call_operand.vmem [shape: f32[96,64], index: 2, kind: input, shape index: {}]   ;;  %s946_s3 = inlined_call_operand.vmem [shape: f32[64,16], index: 3, kind: input, shape index: {}]   ;;  %s947_s4 = inlined_call_operand.vmem [shape: f32[8,128], index: 4, kind: input, shape index: {}]   ;;  %s948_s5 = inlined_call_operand.vmem [shape: f32[125,16], index: 5, kind: output, shape index: {}]  }
   0x1 LB: > { %s610_s19 = sadd.s32 4294967295, %s727_s18   ;;  %p614_p0 = scmp.ge.s32.totalorder %s727_s18, 1  ;;  %s727_s18 = sphi %s759_s18, %s15_s18  }
   0x2   : > { %p188_p1 = scmp.lt.s32.totalorder %s727_s18, 3 }
   0x4   : > { %p189_p2 = pnand %p614_p0, %p188_p1 }
   0x5   : > { %s615_s11 = sshll.u32 (!%p189_p2), %s610_s19, 3 }
   0x6   : > { %192 = sbr.rel (%p189_p2) target bundleno = 529 (0x211), region = 40  ;;  %p217_p3 = scmp.lt.s32.totalorder (!%p189_p2), %s615_s11, 15 }
   0xb   : > { %v252_v0 = vld [vmem:[%s944_s1 + $0x78] sm:$0xff]  ;;  %v251_v1 = vld [vmem:[%s944_s1 + $0x70] sm:$0xff]  ;;  %v250_v2 = vld [vmem:[%s944_s1 + $0x68] sm:$0xff]  ;;  %s950_s11 = smov (!%p217_p3, %s615_s11), 15  ;;  %vm340_vm0 = vcmask 785408   ;;  %vm447_vm1 = vcmask 523264  }
   0xc   : > { %254 = vmatpush.msra.mxu0 %v252_v0  ;;  %637 = vmatpush.msra.mxu3 %v252_v0  ;;  %v249_v3 = vld [vmem:[%s944_s1 + $0x60] sm:$0xff]  ;;  %v248_v4 = vld [vmem:[%s944_s1 + $0x58] sm:$0xff]  ;;  %v247_v5 = vld [vmem:[%s944_s1 + $0x50] sm:$0xff]  ;;  %s616_s23 = sshll.u32 %s950_s11, 3  ;;  %vm545_vm2 = vcmask 130048  }
   0xd   : > { %v246_v6 = vld [vmem:[%s944_s1 + $0x48] sm:$0xff]  ;;  %v245_v7 = vld [vmem:[%s944_s1 + $0x40] sm:$0xff]  ;;  %v244_v8 = vld [vmem:[%s944_s1 + $0x38] sm:$0xff]  ;;  %s820_s30 = scalar_lea.vmem %s943_s0, %s616_s23  ;;  %s922_s8 = scalar_lea.vmem %s948_s5, %s616_s23 }
   0xe   : > { %255 = vmatpush.msra.mxu0 %v251_v1  ;;  %638 = vmatpush.msra.mxu3 %v251_v1  ;;  %v243_v9 = vld [vmem:[%s944_s1 + $0x30] sm:$0xff]  ;;  %v242_v10 = vld [vmem:[%s944_s1 + $0x28] sm:$0xff]  ;;  %v241_v11 = vld [vmem:[%s944_s1 + $0x20] sm:$0xff] }
   0xf   : > { %v240_v12 = vld [vmem:[%s944_s1 + $0x18] sm:$0xff]  ;;  %v239_v13 = vld [vmem:[%s944_s1 + $0x10] sm:$0xff]  ;;  %v238_v14 = vld [vmem:[%s944_s1 + $0x8] sm:$0xff] }
  0x10   : > { %256 = vmatpush.msra.mxu0 %v250_v2  ;;  %639 = vmatpush.msra.mxu3 %v250_v2  ;;  %v237_v15 = vld [vmem:[%s944_s1] sm:$0xff]  ;;  %v234_v17 = vld [vmem:[%s820_s30 + $0x30] sm:$0xff]  ;;  %v229_v18 = vld [vmem:[%s820_s30 + $0x8] sm:$0xff] }
  0x11   : > { %v228_v16 = vld [vmem:[%s820_s30] sm:$0xff]  ;;  %v235_v19 = vld [vmem:[%s820_s30 + $0x38] sm:$0xff]  ;;  %v337_v21 = vld [vmem:[%s945_s2 + $0x50] sm:$0xff] }
  0x12   : > { %257 = vmatpush.msra.mxu0 %v249_v3  ;;  %640 = vmatpush.msra.mxu3 %v249_v3  ;;  %v338_v20 = vld [vmem:[%s945_s2 + $0x58] sm:$0xff]  ;;  %v336_v22 = vld [vmem:[%s945_s2 + $0x48] sm:$0xff]  ;;  %v335_v23 = vld [vmem:[%s945_s2 + $0x40] sm:$0xff] }
  0x13   : > { %369 = vmatpush.msra.mxu1 %v338_v20  ;;  %v230_v24 = vld [vmem:[%s820_s30 + $0x10] sm:$0xff]  ;;  %v231_v25 = vld [vmem:[%s820_s30 + $0x18] sm:$0xff]  ;;  %v232_v26 = vld [vmem:[%s820_s30 + $0x20] sm:$0xff] }
  0x14   : > { %258 = vmatpush.msra.mxu0 %v248_v4  ;;  %641 = vmatpush.msra.mxu3 %v248_v4  ;;  %v233_v27 = vld [vmem:[%s820_s30 + $0x28] sm:$0xff]  ;;  %v334_v28 = vld [vmem:[%s945_s2 + $0x38] sm:$0xff]  ;;  %v333_v29 = vld [vmem:[%s945_s2 + $0x30] sm:$0xff] }
  0x15   : > { %370 = vmatpush.msra.mxu1 %v337_v21  ;;  %v332_v30 = vld [vmem:[%s945_s2 + $0x28] sm:$0xff]  ;;  %v331_v31 = vld [vmem:[%s945_s2 + $0x20] sm:$0xff]  ;;  %v330_v32 = vld [vmem:[%s945_s2 + $0x18] sm:$0xff] }
  0x16   : > { %259 = vmatpush.msra.mxu0 %v247_v5  ;;  %642 = vmatpush.msra.mxu3 %v247_v5  ;;  %v329_v33 = vld [vmem:[%s945_s2 + $0x10] sm:$0xff]  ;;  %v328_v34 = vld [vmem:[%s945_s2 + $0x8] sm:$0xff]  ;;  %v327_v35 = vld [vmem:[%s945_s2] sm:$0xff] }
  0x17   : > { %371 = vmatpush.msra.mxu1 %v336_v22  ;;  %v872_v36 = vld [vmem:[%s947_s4] sm:$0xff] }
  0x18   : > { %260 = vmatpush.msra.mxu0 %v246_v6  ;;  %643 = vmatpush.msra.mxu3 %v246_v6  ;;  %v253_v37 = vperm.slane %v872_v36, 0 }
  0x19   : > { %372 = vmatpush.msra.mxu1 %v335_v23 }
  0x1a   : > { %261 = vmatpush.msra.mxu0 %v245_v7  ;;  %644 = vmatpush.msra.mxu3 %v245_v7 }
  0x1b   : > { %373 = vmatpush.msra.mxu1 %v334_v28 }
  0x1c   : > { %262 = vmatpush.msra.mxu0 %v244_v8  ;;  %645 = vmatpush.msra.mxu3 %v244_v8 }
  0x1d   : > { %374 = vmatpush.msra.mxu1 %v333_v29 }
  0x1e   : > { %263 = vmatpush.msra.mxu0 %v243_v9  ;;  %646 = vmatpush.msra.mxu3 %v243_v9 }
  0x1f   : > { %375 = vmatpush.msra.mxu1 %v332_v30 }
  0x20   : > { %264 = vmatpush.msra.mxu0 %v242_v10  ;;  %647 = vmatpush.msra.mxu3 %v242_v10 }
  0x21   : > { %376 = vmatpush.msra.mxu1 %v331_v31 }
  0x22   : > { %265 = vmatpush.msra.mxu0 %v241_v11  ;;  %648 = vmatpush.msra.mxu3 %v241_v11 }
  0x23   : > { %377 = vmatpush.msra.mxu1 %v330_v32 }
  0x24   : > { %266 = vmatpush.msra.mxu0 %v240_v12  ;;  %649 = vmatpush.msra.mxu3 %v240_v12 }
  0x25   : > { %378 = vmatpush.msra.mxu1 %v329_v33 }
  0x26   : > { %267 = vmatpush.msra.mxu0 %v239_v13  ;;  %650 = vmatpush.msra.mxu3 %v239_v13 }
  0x27   : > { %379 = vmatpush.msra.mxu1 %v328_v34 }
  0x28   : > { %268 = vmatpush.msra.mxu0 %v238_v14  ;;  %651 = vmatpush.msra.mxu3 %v238_v14 }
  0x29   : > { %380 = vmatpush.msra.mxu1 %v327_v35 }
  0x2a   : > { %269 = vmatpush.msra.mxu0 %v237_v15  ;;  %652 = vmatpush.msra.mxu3 %v237_v15 }
  0x2b   : > { %270 = vmatmul.f32.vlgmr.msra.gmra.mxu0 %v228_v16  ;;  %288 = vmatmul.f32.vlgmr.msra.gmra.mxu3 %v234_v17 }
  0x2c   : > { %653 = vmatpush.msrb.mxu3 %v338_v20 }
  0x2e   : > { %654 = vmatpush.msrb.mxu3 %v337_v21 }
  0x30   : > { %655 = vmatpush.msrb.mxu3 %v336_v22  ;;  %v445_v22 = vld [vmem:[%s946_s3 + $0x38] sm:$0xff] }
  0x31   : > { %480 = vmatpush.msra.mxu2 %v445_v22 }
  0x32   : > { %656 = vmatpush.msrb.mxu3 %v335_v23  ;;  %v444_v23 = vld [vmem:[%s946_s3 + $0x30] sm:$0xff] }
  0x33   : > { %273 = vmatmul.f32.gmra.mxu0 %v229_v18  ;;  %291 = vmatmul.f32.gmra.mxu3 %v235_v19 }
  0x34   : > { %657 = vmatpush.msrb.mxu3 %v334_v28  ;;  %481 = vmatpush.msra.mxu2 %v444_v23  ;;  %v439_v28 = vld [vmem:[%s946_s3 + $0x8] sm:$0xff] }
  0x36   : > { %658 = vmatpush.msrb.mxu3 %v333_v29  ;;  %v438_v29 = vld [vmem:[%s946_s3] sm:$0xff] }
  0x38   : > { %659 = vmatpush.msrb.mxu3 %v332_v30  ;;  %v339_v30 = vperm.slane %v872_v36, 1 }
  0x3a   : > { %660 = vmatpush.msrb.mxu3 %v331_v31 }
  0x3b   : > { %276 = vmatmul.f32.gmra.mxu0 %v230_v24  ;;  %v443_v24 = vld [vmem:[%s946_s3 + $0x28] sm:$0xff] }
  0x3c   : > { %661 = vmatpush.msrb.mxu3 %v330_v32  ;;  %482 = vmatpush.msra.mxu2 %v443_v24 }
  0x3e   : > { %662 = vmatpush.msrb.mxu3 %v329_v33 }
  0x40   : > { %663 = vmatpush.msrb.mxu3 %v328_v34 }
  0x42   : > { %664 = vmatpush.msrb.mxu3 %v327_v35 }
  0x43   : > { %279 = vmatmul.f32.gmra.mxu0 %v231_v25  ;;  %v442_v25 = vld [vmem:[%s946_s3 + $0x20] sm:$0xff] }
  0x44   : > { %483 = vmatpush.msra.mxu2 %v442_v25 }
  0x4b   : > { %282 = vmatmul.f32.gmra.mxu0 %v232_v26  ;;  %v441_v26 = vld [vmem:[%s946_s3 + $0x18] sm:$0xff] }
  0x4c   : > { %484 = vmatpush.msra.mxu2 %v441_v26 }
  0x53   : > { %285 = vmatmul.f32.gmra.mxu0 %v233_v27  ;;  %v440_v27 = vld [vmem:[%s946_s3 + $0x10] sm:$0xff] }
  0x54   : > { %485 = vmatpush.msra.mxu2 %v440_v27 }
  0x56   : > { %486 = vmatpush.msra.mxu2 %v439_v28 }
  0x58   : > { %487 = vmatpush.msra.mxu2 %v438_v29 }
  0xa8   : > { %v271_v38 = vpop.f32.mrf.mxu0 }
  0xa9   : > { %v272_v39 = vadd.f32 %v271_v38, %v253_v37 }
  0xab   : > { %v295_v40 = vmul.f32 0.5, %v272_v39 }
  0xad   : > { %673 = vtanh.f32 %v295_v40 }
  0xae   : > { %v289_v43 = vpop.f32.mrf.mxu3 }
  0xaf   : > { %v290_v10 = vadd.f32 %v289_v43, %v253_v37 }
  0xb0   : > { %v274_v41 = vpop.f32.mrf.mxu0 }
  0xb1   : > { %v275_v42 = vadd.f32 %v274_v41, %v253_v37  ;;  %v301_v14 = vmul.f32 0.5, %v290_v10 }
  0xb3   : > { %v674_v44 = vpop.eup %673  ;;  %v296_v45 = vmul.f32 0.5, %v275_v42 }
  0xb4   : > { %v311_v46 = vmul.f32 0.5, %v674_v44 }
  0xb5   : > { %675 = vtanh.f32 %v296_v45 }
  0xb6   : > { %v319_v47 = vadd.f32 0.5, %v311_v46  ;;  %v292_v50 = vpop.f32.mrf.mxu3 }
  0xb7   : > { %v293_v53 = vadd.f32 %v292_v50, %v253_v37 }
  0xb8   : > { %v277_v48 = vpop.f32.mrf.mxu0  ;;  %619 = vmatmul.msk.f32.vlgmr.msra.gmra.mxu1 %vm340_vm0, %v319_v47 }
  0xb9   : > { %v278_v49 = vadd.f32 %v277_v48, %v253_v37  ;;  %v302_v55 = vmul.f32 0.5, %v293_v53 }
  0xbb   : > { %v676_v51 = vpop.eup %675  ;;  %v297_v52 = vmul.f32 0.5, %v278_v49 }
  0xbc   : > { %v312_v54 = vmul.f32 0.5, %v676_v51 }
  0xbd   : > { %677 = vtanh.f32 %v297_v52 }
  0xbe   : > { %v320_v56 = vadd.f32 0.5, %v312_v54  ;;  %679 = vtanh.f32 %v302_v55 }
  0xc0   : > { %v280_v57 = vpop.f32.mrf.mxu0  ;;  %620 = vmatmul.msk.f32.gmra.mxu1 %vm340_vm0, %v320_v56 }
  0xc1   : > { %v281_v58 = vadd.f32 %v280_v57, %v253_v37 }
  0xc3   : > { %v678_v59 = vpop.eup %677  ;;  %v298_v60 = vmul.f32 0.5, %v281_v58 }
  0xc4   : > { %v313_v61 = vmul.f32 0.5, %v678_v59  ;;  %v680_v62 = vpop.eup %679 }
  0xc5   : > { %681 = vtanh.f32 %v298_v60  ;;  %v318_v0 = vmul.f32 0.5, %v680_v62 }
  0xc6   : > { %v321_v63 = vadd.f32 0.5, %v313_v61 }
  0xc7   : > { %v326_v2 = vadd.f32 0.5, %v318_v0 }
  0xc8   : > { %v283_v1 = vpop.f32.mrf.mxu0  ;;  %621 = vmatmul.msk.f32.gmra.mxu1 %vm340_vm0, %v321_v63 }
  0xc9   : > { %v284_v3 = vadd.f32 %v283_v1, %v253_v37  ;;  %626 = vmatmul.msk.f32.vlgmr.msrb.gmra.mxu3 %vm340_vm0, %v326_v2 }
  0xcb   : > { %v682_v4 = vpop.eup %681  ;;  %v299_v5 = vmul.f32 0.5, %v284_v3 }
  0xcc   : > { %v314_v6 = vmul.f32 0.5, %v682_v4 }
  0xcd   : > { %683 = vtanh.f32 %v299_v5 }
  0xce   : > { %v322_v7 = vadd.f32 0.5, %v314_v6 }
  0xd0   : > { %v286_v8 = vpop.f32.mrf.mxu0  ;;  %622 = vmatmul.msk.f32.gmra.mxu1 %vm340_vm0, %v322_v7 }
  0xd1   : > { %v287_v9 = vadd.f32 %v286_v8, %v253_v37 }
  0xd3   : > { %v684_v11 = vpop.eup %683  ;;  %v300_v12 = vmul.f32 0.5, %v287_v9 }
  0xd4   : > { %v315_v13 = vmul.f32 0.5, %v684_v11 }
  0xd5   : > { %685 = vtanh.f32 %v300_v12 }
  0xd6   : > { %v323_v15 = vadd.f32 0.5, %v315_v13  ;;  %687 = vtanh.f32 %v301_v14 }
  0xd8   : > { %623 = vmatmul.msk.f32.gmra.mxu1 %vm340_vm0, %v323_v15 }
  0xdb   : > { %v686_v16 = vpop.eup %685 }
  0xdc   : > { %v316_v17 = vmul.f32 0.5, %v686_v16  ;;  %v688_v19 = vpop.eup %687  ;;  %v446_v16 = vperm.slane %v872_v36, 2 }
  0xdd   : > { %v317_v20 = vmul.f32 0.5, %v688_v19 }
  0xde   : > { %v324_v18 = vadd.f32 0.5, %v316_v17 }
  0xdf   : > { %v325_v21 = vadd.f32 0.5, %v317_v20 }
  0xe0   : > { %624 = vmatmul.msk.f32.gmra.mxu1 %vm340_vm0, %v324_v18 }
  0xe8   : > { %625 = vmatmul.msk.f32.gmra.mxu1 %vm340_vm0, %v325_v21 }
 0x135   : > { %v382_v31 = vpop.f32.mrf.mxu1 }
 0x136   : > { %v383_v32 = vadd.f32 %v382_v31, %v339_v30 }
 0x138   : > { %v406_v33 = vmul.f32 0.5, %v383_v32 }
 0x13a   : > { %689 = vtanh.f32 %v406_v33 }
 0x13d   : > { %v385_v34 = vpop.f32.mrf.mxu1 }
 0x13e   : > { %v386_v35 = vadd.f32 %v385_v34, %v339_v30 }
 0x140   : > { %v690_v37 = vpop.eup %689  ;;  %v407_v38 = vmul.f32 0.5, %v386_v35 }
 0x141   : > { %v422_v39 = vmul.f32 0.5, %v690_v37 }
 0x142   : > { %691 = vtanh.f32 %v407_v38 }
 0x143   : > { %v430_v40 = vadd.f32 0.5, %v422_v39 }
 0x145   : > { %v388_v41 = vpop.f32.mrf.mxu1  ;;  %627 = vmatmul.msk.f32.vlgmr.msra.gmra.mxu2 %vm447_vm1, %v430_v40 }
 0x146   : > { %v389_v42 = vadd.f32 %v388_v41, %v339_v30 }
 0x148   : > { %v692_v43 = vpop.eup %691  ;;  %v408_v44 = vmul.f32 0.5, %v389_v42 }
 0x149   : > { %v423_v45 = vmul.f32 0.5, %v692_v43 }
 0x14a   : > { %693 = vtanh.f32 %v408_v44 }
 0x14b   : > { %v431_v46 = vadd.f32 0.5, %v423_v45 }
 0x14c   : > { %v403_v0 = vpop.f32.mrf.mxu3 }
 0x14d   : > { %v391_v47 = vpop.f32.mrf.mxu1  ;;  %628 = vmatmul.msk.f32.gmra.mxu2 %vm447_vm1, %v431_v46  ;;  %v404_v2 = vadd.f32 %v403_v0, %v339_v30 }
 0x14e   : > { %v392_v48 = vadd.f32 %v391_v47, %v339_v30 }
 0x14f   : > { %v413_v7 = vmul.f32 0.5, %v404_v2 }
 0x150   : > { %v694_v49 = vpop.eup %693  ;;  %v409_v50 = vmul.f32 0.5, %v392_v48 }
 0x151   : > { %v424_v51 = vmul.f32 0.5, %v694_v49 }
 0x152   : > { %695 = vtanh.f32 %v409_v50 }
 0x153   : > { %v432_v52 = vadd.f32 0.5, %v424_v51 }
 0x155   : > { %v394_v53 = vpop.f32.mrf.mxu1  ;;  %629 = vmatmul.msk.f32.gmra.mxu2 %vm447_vm1, %v432_v52 }
 0x156   : > { %v395_v54 = vadd.f32 %v394_v53, %v339_v30 }
 0x158   : > { %v696_v55 = vpop.eup %695  ;;  %v410_v56 = vmul.f32 0.5, %v395_v54 }
 0x159   : > { %v425_v57 = vmul.f32 0.5, %v696_v55 }
 0x15a   : > { %697 = vtanh.f32 %v410_v56 }
 0x15b   : > { %v433_v58 = vadd.f32 0.5, %v425_v57 }
 0x15d   : > { %v397_v59 = vpop.f32.mrf.mxu1  ;;  %630 = vmatmul.msk.f32.gmra.mxu2 %vm447_vm1, %v433_v58 }
 0x15e   : > { %v398_v60 = vadd.f32 %v397_v59, %v339_v30 }
 0x160   : > { %v698_v61 = vpop.eup %697  ;;  %v411_v62 = vmul.f32 0.5, %v398_v60 }
 0x161   : > { %v426_v63 = vmul.f32 0.5, %v698_v61 }
 0x162   : > { %699 = vtanh.f32 %v411_v62 }
 0x163   : > { %v434_v1 = vadd.f32 0.5, %v426_v63 }
 0x165   : > { %v400_v3 = vpop.f32.mrf.mxu1  ;;  %631 = vmatmul.msk.f32.gmra.mxu2 %vm447_vm1, %v434_v1 }
 0x166   : > { %v401_v4 = vadd.f32 %v400_v3, %v339_v30 }
 0x168   : > { %v700_v5 = vpop.eup %699  ;;  %v412_v6 = vmul.f32 0.5, %v401_v4 }
 0x169   : > { %v427_v8 = vmul.f32 0.5, %v700_v5 }
 0x16a   : > { %701 = vtanh.f32 %v412_v6 }
 0x16b   : > { %v435_v9 = vadd.f32 0.5, %v427_v8  ;;  %703 = vtanh.f32 %v413_v7 }
 0x16d   : > { %632 = vmatmul.msk.f32.gmra.mxu2 %vm447_vm1, %v435_v9 }
 0x170   : > { %v702_v10 = vpop.eup %701 }
 0x171   : > { %v428_v11 = vmul.f32 0.5, %v702_v10  ;;  %v704_v12 = vpop.eup %703 }
 0x172   : > { %v429_v14 = vmul.f32 0.5, %v704_v12 }
 0x173   : > { %v436_v13 = vadd.f32 0.5, %v428_v11 }
 0x174   : > { %v437_v15 = vadd.f32 0.5, %v429_v14 }
 0x175   : > { %633 = vmatmul.msk.f32.gmra.mxu2 %vm447_vm1, %v436_v13 }
 0x17d   : > { %634 = vmatmul.msk.f32.gmra.mxu2 %vm447_vm1, %v437_v15 }
 0x1c8   : > { %v489_v17 = vpop.f32.mrf.mxu2 }
 0x1c9   : > { %v490_v18 = vadd.f32 %v489_v17, %v446_v16 }
 0x1cb   : > { %v513_v19 = vmul.f32 0.5, %v490_v18 }
 0x1cd   : > { %705 = vtanh.f32 %v513_v19 }
 0x1d0   : > { %v492_v20 = vpop.f32.mrf.mxu2 }
 0x1d1   : > { %v493_v21 = vadd.f32 %v492_v20, %v446_v16 }
 0x1d3   : > { %v706_v22 = vpop.eup %705  ;;  %v514_v23 = vmul.f32 0.5, %v493_v21 }
 0x1d4   : > { %v529_v24 = vmul.f32 0.5, %v706_v22 }
 0x1d5   : > { %707 = vtanh.f32 %v514_v23 }
 0x1d6   : > { %v537_v36 = vadd.f32 0.5, %v529_v24 }
 0x1d8   : > { %546 = vst.msk [vmem:[%s922_s8] sm:$0xff] %vm545_vm2, %v537_v36  ;;  %v495_v25 = vpop.f32.mrf.mxu2 }
 0x1d9   : > { %v496_v26 = vadd.f32 %v495_v25, %v446_v16 }
 0x1db   : > { %v708_v27 = vpop.eup %707  ;;  %v515_v28 = vmul.f32 0.5, %v496_v26 }
 0x1dc   : > { %v530_v29 = vmul.f32 0.5, %v708_v27 }
 0x1dd   : > { %709 = vtanh.f32 %v515_v28 }
 0x1de   : > { %v538_v30 = vadd.f32 0.5, %v530_v29 }
 0x1e0   : > { %547 = vst.msk [vmem:[%s922_s8 + $0x8] sm:$0xff] %vm545_vm2, %v538_v30  ;;  %v498_v31 = vpop.f32.mrf.mxu2 }
 0x1e1   : > { %v499_v32 = vadd.f32 %v498_v31, %v446_v16 }
 0x1e3   : > { %v710_v33 = vpop.eup %709  ;;  %v516_v34 = vmul.f32 0.5, %v499_v32 }
 0x1e4   : > { %v531_v35 = vmul.f32 0.5, %v710_v33 }
 0x1e5   : > { %711 = vtanh.f32 %v516_v34 }
 0x1e6   : > { %v539_v37 = vadd.f32 0.5, %v531_v35 }
 0x1e8   : > { %548 = vst.msk [vmem:[%s922_s8 + $0x10] sm:$0xff] %vm545_vm2, %v539_v37  ;;  %v501_v38 = vpop.f32.mrf.mxu2 }
 0x1e9   : > { %v502_v39 = vadd.f32 %v501_v38, %v446_v16 }
 0x1eb   : > { %v712_v40 = vpop.eup %711  ;;  %v517_v41 = vmul.f32 0.5, %v502_v39 }
 0x1ec   : > { %v532_v42 = vmul.f32 0.5, %v712_v40 }
 0x1ed   : > { %713 = vtanh.f32 %v517_v41 }
 0x1ee   : > { %v540_v43 = vadd.f32 0.5, %v532_v42 }
 0x1f0   : > { %549 = vst.msk [vmem:[%s922_s8 + $0x18] sm:$0xff] %vm545_vm2, %v540_v43  ;;  %v504_v44 = vpop.f32.mrf.mxu2 }
 0x1f1   : > { %v505_v45 = vadd.f32 %v504_v44, %v446_v16 }
 0x1f3   : > { %v714_v46 = vpop.eup %713  ;;  %v518_v47 = vmul.f32 0.5, %v505_v45 }
 0x1f4   : > { %v533_v48 = vmul.f32 0.5, %v714_v46 }
 0x1f5   : > { %715 = vtanh.f32 %v518_v47 }
 0x1f6   : > { %v541_v49 = vadd.f32 0.5, %v533_v48 }
 0x1f8   : > { %550 = vst.msk [vmem:[%s922_s8 + $0x20] sm:$0xff] %vm545_vm2, %v541_v49  ;;  %v507_v50 = vpop.f32.mrf.mxu2 }
 0x1f9   : > { %v508_v51 = vadd.f32 %v507_v50, %v446_v16 }
 0x1fb   : > { %v716_v52 = vpop.eup %715  ;;  %v519_v53 = vmul.f32 0.5, %v508_v51 }
 0x1fc   : > { %v534_v54 = vmul.f32 0.5, %v716_v52 }
 0x1fd   : > { %717 = vtanh.f32 %v519_v53 }
 0x1fe   : > { %v542_v55 = vadd.f32 0.5, %v534_v54 }
 0x200   : > { %551 = vst.msk [vmem:[%s922_s8 + $0x28] sm:$0xff] %vm545_vm2, %v542_v55  ;;  %v510_v56 = vpop.f32.mrf.mxu2 }
 0x201   : > { %v511_v57 = vadd.f32 %v510_v56, %v446_v16 }
 0x203   : > { %v718_v58 = vpop.eup %717  ;;  %v520_v59 = vmul.f32 0.5, %v511_v57 }
 0x204   : > { %v535_v60 = vmul.f32 0.5, %v718_v58 }
 0x205   : > { %719 = vtanh.f32 %v520_v59 }
 0x206   : > { %v543_v61 = vadd.f32 0.5, %v535_v60 }
 0x208   : > { %552 = vst.msk [vmem:[%s922_s8 + $0x30] sm:$0xff] %vm545_vm2, %v543_v61 }
 0x20b   : > { %v720_v62 = vpop.eup %719 }
 0x20c   : > { %v536_v63 = vmul.f32 0.5, %v720_v62 }
 0x20e   : > { %v544_v0 = vadd.f32 0.5, %v536_v63 }
 0x210   : > { %553 = vst.msk [vmem:[%s922_s8 + $0x38] sm:$0xff] %vm545_vm2, %v544_v0 }
 0x211 PF: > { %s15_s18 = sadd.s32 1, %s727_s18  }
 0x212   : > { %p12_p4 = scmp.ge.s32.totalorder %s15_s18, 4  }
 0x214   :  { %14 = sbr.rel (!%p12_p4) target bundleno = 1 (0x1), region = 70 }

</bundles_post_ra>
